<compile_context>
chip_gen: v5e
topology: v5e:2x2
jax: 0.10.0
libtpu: 0.0.40
codegen_flags: <defaults>
</compile_context>

<pallas_src>
import functools

import jax
import jax.numpy as jnp
from jax.experimental import pallas as pl
from jax.experimental.pallas import tpu as pltpu

# ----------------------------- model hyper-params (constructor args) ----------
MID = 8            # mid_channels (scaled-down proxy; multiple of 8)
NUM_BLOCKS = 2     # num_blocks of each propagation backbone
DG = 16            # deform_groups (hard-coded in the reference module)
MAX_MAG = 10.0     # max_residue_magnitude
MIN_GRID_CELLS = 2  # >=2 grid cells: v7x megacore sharding + >=2 pipeline steps


# --------------------------- hardware-derived budgets --------------------------
@functools.lru_cache(maxsize=1)
def _hw_budgets():
    """(per-band VMEM working-set budget, vmem_limit_bytes) derived from HW."""
    cap = None
    try:
        info = pltpu.get_tpu_info()
        for a in ("vmem_capacity_bytes", "vmem_bytes", "vmem_size_bytes"):
            v = getattr(info, a, None)
            if v:
                cap = int(v)
                break
    except Exception:
        cap = None
    if cap is None:
        try:
            kind = jax.devices()[0].device_kind.lower()
            cap = (64 << 20) if "v7" in kind else (128 << 20)
        except Exception:
            cap = 128 << 20
    limit = min(cap, max(32 << 20, min(int(cap * 0.8), cap - (16 << 20))))
    budget = max(8 << 20, min(int(cap * 0.55), limit - (8 << 20)))
    return budget, limit


# ============================= Pallas fused conv kernel ========================
def _epilogue(acc, b, act):
    acc = acc + b                         # (TCout, 1) broadcast
    if act == "lrelu":
        return jnp.where(acc >= 0, acc, 0.1 * acc)
    if act == "relu":
        return jnp.maximum(acc, 0.0)
    return acc


def _conv_fold_kernel(x_ref, w_ref, b_ref, o_ref, col_ref, *, taps, cin, slab, act):
    # x_ref  : (1, Cin, LIN)      bf16  flattened zero-padded input band
    # w_ref  : (TCout, K*K*Cin)   bf16  folded weight matrix (columns: tap-major, cin-minor)
    # b_ref  : (TCout, 1)         f32
    # o_ref  : (1, TCout, slab)   f32   lane-dense output slab (TH * Wp)
    # col_ref: (K*K*Cin, slab)    bf16  VMEM im2col scratch
    for t, off in enumerate(taps):                      # statically unrolled
        col_ref[pl.ds(t * cin, cin), :] = x_ref[0, :, pl.ds(off, slab)]
    acc = jnp.dot(w_ref[...], col_ref[...], preferred_element_type=jnp.float32)
    o_ref[0] = _epilogue(acc, b_ref[...], act)


def _conv_1x1_kernel(x_ref, w_ref, b_ref, o_ref, *, act):
    # 1x1 conv (deformable-conv channel reduction): no im2col needed.
    acc = jnp.dot(w_ref[...], x_ref[0], preferred_element_type=jnp.float32)
    o_ref[0] = _epilogue(acc, b_ref[...], act)


def _pick_tc(cout):
    """Returns (TCout, Cout_pad): Cout padded to a multiple of 8 / the tile."""
    cpad = ((cout + 7) // 8) * 8
    if cpad <= 64:
        return cpad, cpad
    for tc in (64, 56, 48, 40, 32, 24, 16, 8):
        if cpad % tc == 0:
            return tc, cpad
    cpad = ((cout + 63) // 64) * 64
    return 64, cpad


def _pick_th(N, H, W, Cin, K, TCout, n_ctiles, budget):
    """Largest divisor of H whose per-band VMEM working set fits the budget."""
    P = K // 2
    Wp = W + 2 * P
    KK = K * K

    def cost(th):
        slab = th * Wp
        c = 2 * Cin * (th + 2 * P) * Wp * 2            # bf16 input band x2 buffers
        if KK > 1:
            c += KK * Cin * slab * 2                    # bf16 im2col scratch
        c += 3 * TCout * slab * 4                       # f32 out slab x2 bufs + acc temp
        c += 2 * (KK * Cin * TCout * 2 + TCout * 4)     # weights + bias x2 buffers
        c += 2 << 20                                    # misc slack
        return c

    min_nb = 1
    if N * n_ctiles < MIN_GRID_CELLS and H >= 16 and H % 2 == 0:
        min_nb = 2                                      # force >=2 bands (cheap halo)
    th = 1
    for d in range(H, 0, -1):
        if H % d:
            continue
        if H // d < min_nb:
            continue
        if cost(d) <= budget:
            th = d
            break
    return th


@functools.lru_cache(maxsize=None)
def _get_conv_call(NB, Cin, Cout_pad, K, LIN, Wp, slab, TCout, act, vmem_limit):
    KK = K * K
    if KK == 1:
        kern = functools.partial(_conv_1x1_kernel, act=act)
        scratch = []
    else:
        taps = tuple(kh * Wp + kw for kh in range(K) for kw in range(K))
        kern = functools.partial(_conv_fold_kernel, taps=taps, cin=Cin,
                                 slab=slab, act=act)
        scratch = [pltpu.VMEM((KK * Cin, slab), jnp.bfloat16)]
    return pl.pallas_call(
        kern,
        grid=(NB, Cout_pad // TCout),
        in_specs=[
            pl.BlockSpec((1, Cin, LIN), lambda i, j: (i, 0, 0)),
            pl.BlockSpec((TCout, KK * Cin), lambda i, j: (j, 0)),
            pl.BlockSpec((TCout, 1), lambda i, j: (j, 0)),
        ],
        out_specs=pl.BlockSpec((1, TCout, slab), lambda i, j: (i, j, 0)),
        out_shape=jax.ShapeDtypeStruct((NB, Cout_pad, slab), jnp.float32),
        scratch_shapes=scratch,
        compiler_params=pltpu.CompilerParams(
            dimension_semantics=("parallel", "parallel"),
            vmem_limit_bytes=vmem_limit),
    )


def conv2d(x, w, b, act="none"):
    """NCHW conv, stride 1, 'SAME' padding (odd K).  x f32 -> out f32.

    w is HWIO: (K, K, Cin, Cout)."""
    budget, vmem_limit = _hw_budgets()
    N, Cin, H, W = map(int, x.shape)
    K = int(w.shape[0])
    Cout = int(w.shape[3])
    P = K // 2
    Wp = W + 2 * P
    TCout, Cout_pad = _pick_tc(Cout)
    n_ctiles = Cout_pad // TCout
    TH = _pick_th(N, H, W, Cin, K, TCout, n_ctiles, budget)
    nb = H // TH
    THp = TH + 2 * P
    slab = TH * Wp
    LIN = THp * Wp + 2 * P     # +2P so the last tap's shifted slice stays in bounds

    xp = jnp.pad(x, ((0, 0), (0, 0), (P, P), (P, P)))
    if nb > 1:
        # Overlapping halo bands (duplicates 2P rows per band; <= 2P/TH extra HBM).
        # TODO(synk): read the overlapping windows in place (manual DMA / element
        #             offsets) to avoid this copy entirely.
        xb = jnp.stack([xp[:, :, i * TH:i * TH + THp, :] for i in range(nb)],
                       axis=1).reshape(N * nb, Cin, THp, Wp)
    else:
        xb = xp
    xb = xb.reshape(N * nb, Cin, THp * Wp)
    if P > 0:
        xb = jnp.pad(xb, ((0, 0), (0, 0), (0, 2 * P)))
    xb = xb.astype(jnp.bfloat16)

    # folded weight: column index = (kh*K + kw)*Cin + c, matching the im2col rows
    wr = jnp.transpose(w, (3, 0, 1, 2)).reshape(Cout, K * K * Cin)
    br = b
    if Cout_pad != Cout:
        wr = jnp.pad(wr, ((0, Cout_pad - Cout), (0, 0)))
        br = jnp.pad(br, (0, Cout_pad - Cout))
    wr = wr.astype(jnp.bfloat16)
    br = br.reshape(Cout_pad, 1).astype(jnp.float32)

    out = _get_conv_call(N * nb, Cin, Cout_pad, K, LIN, Wp, slab, TCout, act,
                         vmem_limit)(xb, wr, br)
    # The flat-slab tap trick writes 2P wrapped (garbage) columns per output row;
    # the [:, :, :, :, :W] crop below removes them -- do not remove the crop.
    out = out.reshape(N, nb, Cout_pad, TH, Wp)[:, :, :Cout, :, :W]
    out = jnp.transpose(out, (0, 2, 1, 3, 4)).reshape(N, Cout, H, W)
    return out


# ============================= JAX glue helpers (NCHW) =========================
def bilinear_sample(x, sy, sx, padding="zeros"):
    # x: (B, C, H, W); sy, sx: (B, Ho, Wo) pixel coords (align_corners=True convention).
    B, C, H, W = x.shape
    Ho, Wo = sy.shape[1], sy.shape[2]
    if padding == "border":
        sy = jnp.clip(sy, 0.0, H - 1.0)
        sx = jnp.clip(sx, 0.0, W - 1.0)
    y0f = jnp.floor(sy)
    x0f = jnp.floor(sx)
    ty = sy - y0f
    tx = sx - x0f
    xf = x.reshape(B, C, H * W)
    out = jnp.zeros((B, C, Ho * Wo), x.dtype)
    for dy in (0, 1):
        for dx in (0, 1):
            yi = y0f + dy
            xi = x0f + dx
            wgt = (ty if dy else 1.0 - ty) * (tx if dx else 1.0 - tx)
            if padding == "zeros":
                valid = (yi >= 0) & (yi <= H - 1) & (xi >= 0) & (xi <= W - 1)
                wgt = wgt * valid.astype(x.dtype)
            yc = jnp.clip(yi, 0, H - 1).astype(jnp.int32)
            xc = jnp.clip(xi, 0, W - 1).astype(jnp.int32)
            idx = (yc * W + xc).reshape(B, 1, Ho * Wo)
            idx = jnp.broadcast_to(idx, (B, C, Ho * Wo))
            g = jnp.take_along_axis(xf, idx, axis=2)
            out = out + wgt.reshape(B, 1, Ho * Wo) * g
    return out.reshape(B, C, Ho, Wo)


def flow_warp(x, flow, padding="zeros"):
    # x: (B, C, H, W); flow: (B, 2, H, W) with channel 0 = dx, channel 1 = dy.
    B, _, H, W = flow.shape
    gy = jnp.arange(H, dtype=jnp.float32).reshape(1, H, 1)
    gx = jnp.arange(W, dtype=jnp.float32).reshape(1, 1, W)
    return bilinear_sample(x, gy + flow[:, 1], gx + flow[:, 0], padding=padding)


def resize_bilinear(x, out_h, out_w, align_corners):
    B, C, H, W = x.shape
    if (out_h, out_w) == (H, W):
        return x
    if align_corners:
        sy = jnp.arange(out_h, dtype=jnp.float32) * ((H - 1) / (out_h - 1) if out_h > 1 else 0.0)
        sx = jnp.arange(out_w, dtype=jnp.float32) * ((W - 1) / (out_w - 1) if out_w > 1 else 0.0)
    else:
        sy = jnp.maximum((jnp.arange(out_h, dtype=jnp.float32) + 0.5) * (H / out_h) - 0.5, 0.0)
        sx = jnp.maximum((jnp.arange(out_w, dtype=jnp.float32) + 0.5) * (W / out_w) - 0.5, 0.0)
    y0 = jnp.floor(sy).astype(jnp.int32)
    y1 = jnp.minimum(y0 + 1, H - 1)
    ty = (sy - y0)[None, None, :, None]
    x0 = jnp.floor(sx).astype(jnp.int32)
    x1 = jnp.minimum(x0 + 1, W - 1)
    tx = (sx - x0)[None, None, None, :]
    top = x[:, :, y0][:, :, :, x0] * (1 - tx) + x[:, :, y0][:, :, :, x1] * tx
    bot = x[:, :, y1][:, :, :, x0] * (1 - tx) + x[:, :, y1][:, :, :, x1] * tx
    return top * (1 - ty) + bot * ty


def avg_pool2x2(x):
    N, C, H, W = x.shape
    return x.reshape(N, C, H // 2, 2, W // 2, 2).mean(axis=(3, 5))


# ============================= sub-modules =====================================
def resblocks_forward(p, x):
    # ResidualBlocksWithInputConv: conv+lrelu, then n x (conv-relu-conv + skip)
    x = conv2d(x, p["head"]["w"], p["head"]["b"], act="lrelu")
    for blk in p["blocks"]:
        y = conv2d(x, blk["c1"]["w"], blk["c1"]["b"], act="relu")
        y = conv2d(y, blk["c2"]["w"], blk["c2"]["b"], act="none")
        x = x + y
    return x


def pixel_shuffle_pack(p, x, scale):
    # lrelu (elementwise) commutes with pixel_shuffle (a permutation) -> fused into the conv.
    y = conv2d(x, p["w"], p["b"], act="lrelu")
    N, Crr, H, W = y.shape
    C = Crr // (scale * scale)
    y = y.reshape(N, C, scale, scale, H, W)
    y = jnp.transpose(y, (0, 1, 4, 2, 5, 3))
    return y.reshape(N, C, H * scale, W * scale)


def spynet_basic_module(mod_p, x):
    acts = ["relu", "relu", "relu", "relu", "none"]
    for cp, a in zip(mod_p, acts):
        x = conv2d(x, cp["w"], cp["b"], act=a)
    return x


def spynet_compute_flow(sp_p, ref, supp):
    B, _, H, W = ref.shape
    mean = jnp.array([0.485, 0.456, 0.406], jnp.float32).reshape(1, 3, 1, 1)
    std = jnp.array([0.229, 0.224, 0.225], jnp.float32).reshape(1, 3, 1, 1)
    refs = [(ref - mean) / std]
    supps = [(supp - mean) / std]
    for _ in range(5):
        refs.append(avg_pool2x2(refs[-1]))
        supps.append(avg_pool2x2(supps[-1]))
    refs, supps = refs[::-1], supps[::-1]
    flow = jnp.zeros((B, 2, H // 32, W // 32), jnp.float32)
    for level in range(6):
        if level == 0:
            flow_up = flow
        else:
            hh, ww = refs[level].shape[2:4]
            flow_up = resize_bilinear(flow, hh, ww, align_corners=True) * 2.0
        warped = flow_warp(supps[level], flow_up, padding="border")
        inp = jnp.concatenate([refs[level], warped, flow_up], axis=1)   # 3+3+2 = 8 ch
        flow = flow_up + spynet_basic_module(sp_p[level], inp)
    return flow


def spynet_forward(sp_p, ref, supp):
    B, _, h, w = ref.shape
    w_up = w if w % 32 == 0 else 32 * (w // 32 + 1)
    h_up = h if h % 32 == 0 else 32 * (h // 32 + 1)
    if (h_up, w_up) != (h, w):
        ref = resize_bilinear(ref, h_up, w_up, False)
        supp = resize_bilinear(supp, h_up, w_up, False)
    flow = spynet_compute_flow(sp_p, ref, supp)
    if (h_up, w_up) != (h, w):
        flow = resize_bilinear(flow, h, w, False)
        flow = flow * jnp.array([w / w_up, h / h_up], jnp.float32).reshape(1, 2, 1, 1)
    return flow


# --------------------- modulated deformable conv (2nd order align) ------------
def modulated_deform_conv(x, offset, mask, w_mat, b):
    # x: (N, Cin, H, W); offset: (N, DG*2*9, H, W) laid out [g, k, (dy, dx)];
    # mask: (N, DG*9, H, W) laid out [g, k].
    # TODO(synk): DCNv2 channel ordering is assumed to match mmcv; verify against
    #             the reference layout before loading real checkpoints.
    N, Cin, H, W = x.shape
    KK = 9
    cpg = Cin // DG
    off = offset.reshape(N, DG, KK, 2, H, W)
    dy, dx = off[:, :, :, 0], off[:, :, :, 1]                  # (N, DG, KK, H, W)
    m = mask.reshape(N, DG, KK, H, W)
    base_y = jnp.arange(H, dtype=jnp.float32).reshape(1, 1, 1, H, 1)
    base_x = jnp.arange(W, dtype=jnp.float32).reshape(1, 1, 1, 1, W)
    k_idx = jnp.arange(KK)
    ky = (k_idx // 3 - 1).astype(jnp.float32).reshape(1, 1, KK, 1, 1)
    kx = (k_idx % 3 - 1).astype(jnp.float32).reshape(1, 1, KK, 1, 1)
    # lane-dense gather layout: all 9 taps x H*W pixels on the minor axis
    sy = (base_y + ky + dy).reshape(N * DG, 1, KK * H * W)
    sx = (base_x + kx + dx).reshape(N * DG, 1, KK * H * W)
    mm = m.reshape(N * DG, 1, KK * H * W)
    x_g = x.reshape(N * DG, cpg, H * W)          # channels on sublanes, pixels on lanes
    y0f = jnp.floor(sy)
    x0f = jnp.floor(sx)
    ty = sy - y0f
    tx = sx - x0f
    samp = jnp.zeros((N * DG, cpg, KK * H * W), x.dtype)
    for dyc in (0, 1):
        for dxc in (0, 1):
            yi = y0f + dyc
            xi = x0f + dxc
            wgt = (ty if dyc else 1.0 - ty) * (tx if dxc else 1.0 - tx)
            valid = (yi >= 0) & (yi <= H - 1) & (xi >= 0) & (xi <= W - 1)
            wgt = wgt * valid.astype(x.dtype)
            yc = jnp.clip(yi, 0, H - 1).astype(jnp.int32)
            xc = jnp.clip(xi, 0, W - 1).astype(jnp.int32)
            idx = jnp.broadcast_to(yc * W + xc, (N * DG, cpg, KK * H * W))
            g = jnp.take_along_axis(x_g, idx, axis=2)
            samp = samp + wgt * g
    samp = samp * mm                                            # (N*DG, cpg, KK*H*W)
    # channel layout after the contiguous reshape is (g, cp, k) == c*9 + k,
    # matching w_mat's row ordering.
    samp = samp.reshape(N, Cin * KK, H, W)
    w1 = w_mat.reshape(1, 1, Cin * KK, w_mat.shape[1])
    return conv2d(samp, w1, b, act="none")       # lane-dense Pallas 1x1 reduction


def deform_align_forward(p, x, extra_feat, flow_1, flow_2):
    extra = jnp.concatenate([extra_feat, flow_1, flow_2], axis=1)   # (N, 3*MID+4, H, W)
    o = conv2d(extra, p["off"][0]["w"], p["off"][0]["b"], act="lrelu")
    o = conv2d(o, p["off"][1]["w"], p["off"][1]["b"], act="lrelu")
    o = conv2d(o, p["off"][2]["w"], p["off"][2]["b"], act="lrelu")
    out = conv2d(o, p["off"][3]["w"], p["off"][3]["b"], act="none")  # (N, 27*DG, H, W)
    c9 = 9 * DG
    o1, o2, mask = out[:, :c9], out[:, c9:2 * c9], out[:, 2 * c9:]
    offset = MAX_MAG * jnp.tanh(jnp.concatenate([o1, o2], axis=1))
    offset_1, offset_2 = offset[:, :c9], offset[:, c9:]
    offset_1 = offset_1 + jnp.tile(flow_1[:, ::-1], (1, c9 // 2, 1, 1))
    offset_2 = offset_2 + jnp.tile(flow_2[:, ::-1], (1, c9 // 2, 1, 1))
    offset = jnp.concatenate([offset_1, offset_2], axis=1)
    mask = jax.nn.sigmoid(mask)
    return modulated_deform_conv(x, offset, mask, p["w_mat"], p["b"])


# ------------------------------ jitted sub-graphs ------------------------------
@jax.jit
def _resblocks_jit(p, x):
    return resblocks_forward(p, x)


@functools.partial(jax.jit, static_argnames=("second",))
def _second_order_glue(feat_prop, feat_n2, flow_n1, flow_n2_raw, second):
    cond_n1 = flow_warp(feat_prop, flow_n1, padding="zeros")
    if second:
        flow_n2 = flow_n1 + flow_warp(flow_n2_raw, flow_n1, padding="zeros")
        cond_n2 = flow_warp(feat_n2, flow_n2, padding="zeros")
    else:
        flow_n2 = jnp.zeros_like(flow_n1)
        cond_n2 = jnp.zeros_like(cond_n1)
    return cond_n1, cond_n2, flow_n2


@jax.jit
def _deform_align_jit(p, feat_prop, feat_n2, cond_n1, feat_current, cond_n2,
                      flow_n1, flow_n2):
    cond = jnp.concatenate([cond_n1, feat_current, cond_n2], axis=1)
    x = jnp.concatenate([feat_prop, feat_n2], axis=1)
    return deform_align_forward(p, x, cond, flow_n1, flow_n2)


@jax.jit
def _backbone_step_jit(p, feat_list, feat_prop):
    feat = jnp.concatenate(list(feat_list) + [feat_prop], axis=1)
    return feat_prop + resblocks_forward(p, feat)


@jax.jit
def _spynet_jit(sp_p, ref, supp):
    return spynet_forward(sp_p, ref, supp)


@jax.jit
def _upsample_jit(up_p, hr_in, lq_flat):
    hr = resblocks_forward(up_p["reconstruction"], hr_in)
    hr = pixel_shuffle_pack(up_p["upsample1"], hr, 2)
    hr = pixel_shuffle_pack(up_p["upsample2"], hr, 2)
    hr = conv2d(hr, up_p["conv_hr"]["w"], up_p["conv_hr"]["b"], act="lrelu")
    hr = conv2d(hr, up_p["conv_last"]["w"], up_p["conv_last"]["b"], act="none")
    H4, W4 = hr.shape[2], hr.shape[3]
    return hr + resize_bilinear(lq_flat, H4, W4, align_corners=False)


# ------------------------------- forward pass ----------------------------------
def compute_flow(sp_p, lqs):
    n, t, c, h, w = lqs.shape
    lqs_1 = lqs[:, :-1].reshape(-1, c, h, w)
    lqs_2 = lqs[:, 1:].reshape(-1, c, h, w)
    flows_backward = _spynet_jit(sp_p, lqs_1, lqs_2).reshape(n, t - 1, 2, h, w)
    flows_forward = _spynet_jit(sp_p, lqs_2, lqs_1).reshape(n, t - 1, 2, h, w)
    return flows_forward, flows_backward


def propagate(params, feats, flows, module_name):
    n, t_m1, _, h, w = flows.shape
    t = t_m1
    frame_idx = list(range(0, t + 1))
    flow_idx = list(range(-1, t))
    if "backward" in module_name:
        frame_idx = frame_idx[::-1]
        flow_idx = frame_idx
    feat_prop = jnp.zeros((n, MID, h, w), jnp.float32)
    da_p = params["deform_align"][module_name]
    bb_p = params["backbone"][module_name]
    for i, idx in enumerate(frame_idx):
        feat_current = feats["spatial"][idx]
        if i > 0:
            flow_n1 = flows[:, flow_idx[i]]
            if i > 1:
                feat_n2 = feats[module_name][-2]
                flow_n2_raw = flows[:, flow_idx[i - 1]]
            else:
                feat_n2 = jnp.zeros_like(feat_prop)
                flow_n2_raw = jnp.zeros_like(flow_n1)
            cond_n1, cond_n2, flow_n2 = _second_order_glue(
                feat_prop, feat_n2, flow_n1, flow_n2_raw, second=(i > 1))
            feat_prop = _deform_align_jit(
                da_p, feat_prop, feat_n2, cond_n1, feat_current, cond_n2,
                flow_n1, flow_n2)
        prev = [feats[k][idx] for k in feats if k not in ("spatial", module_name)]
        feat_prop = _backbone_step_jit(bb_p, tuple([feat_current] + prev), feat_prop)
        feats[module_name].append(feat_prop)
    if "backward" in module_name:
        feats[module_name] = feats[module_name][::-1]
    return feats


def upsample_forward(params, lqs, feats):
    n, t, c, h, w = lqs.shape
    keys = [k for k in feats if k != "spatial"]
    hr_frames = [jnp.concatenate([feats["spatial"][i]] + [feats[k][i] for k in keys],
                                 axis=1) for i in range(t)]
    hr_in = jnp.stack(hr_frames, axis=1).reshape(n * t, 5 * MID, h, w)
    lq_flat = lqs.reshape(n * t, c, h, w)
    up_p = {k: params[k] for k in
            ("reconstruction", "upsample1", "upsample2", "conv_hr", "conv_last")}
    hr = _upsample_jit(up_p, hr_in, lq_flat)                        # (n*t, 3, 4h, 4w)
    return hr.reshape(n, t, 3, 4 * h, 4 * w)


def basicvsr_pp_forward(params, lqs):
    n, t, c, h, w = lqs.shape
    lqs = lqs.astype(jnp.float32)
    lqs_downsample = lqs                                            # is_low_res_input=True
    assert lqs_downsample.shape[3] >= 64 and lqs_downsample.shape[4] >= 64, \
        "The height and width of low-res inputs must be at least 64."
    # feat_extract batched over all frames in a single jitted call
    feat_all = _resblocks_jit(params["feat_extract"],
                              lqs.reshape(n * t, c, h, w)).reshape(n, t, MID, h, w)
    feats = {"spatial": [feat_all[:, i] for i in range(t)]}
    flows_forward, flows_backward = compute_flow(params["spynet"], lqs_downsample)
    for iter_ in [1, 2]:
        for direction in ["backward", "forward"]:
            module = f"{direction}_{iter_}"
            feats[module] = []
            flows = flows_backward if direction == "backward" else flows_forward
            propagate(params, feats, flows, module)
    return upsample_forward(params, lqs, feats)


# ============================= parameter init ==================================
class KeyGen:
    def __init__(self, seed):
        self.key = jax.random.PRNGKey(seed)

    def __call__(self):
        self.key, sub = jax.random.split(self.key)
        return sub


def conv_init(kg, cin, cout, k, zero=False):
    if zero:   # constant_init(val=0, bias=0) for the last conv of conv_offset
        return {"w": jnp.zeros((k, k, cin, cout), jnp.float32),
                "b": jnp.zeros((cout,), jnp.float32)}
    std = (2.0 / (cin * k * k)) ** 0.5
    return {"w": std * jax.random.normal(kg(), (k, k, cin, cout), jnp.float32),
            "b": 0.01 * jax.random.normal(kg(), (cout,), jnp.float32)}


def resblocks_init(kg, cin, mid, nblocks):
    return {"head": conv_init(kg, cin, mid, 3),
            "blocks": [{"c1": conv_init(kg, mid, mid, 3),
                        "c2": conv_init(kg, mid, mid, 3)} for _ in range(nblocks)]}


def deform_align_init(kg, mid, dg):
    p = {"off": [conv_init(kg, 3 * mid + 4, mid, 3),
                 conv_init(kg, mid, mid, 3),
                 conv_init(kg, mid, mid, 3),
                 conv_init(kg, mid, 27 * dg, 3, zero=True)]}
    cin = 2 * mid
    std = (2.0 / (cin * 9)) ** 0.5
    # equals torch_weight.transpose(1, 2, 3, 0).reshape(cin*9, mid) of the deform conv weight
    p["w_mat"] = std * jax.random.normal(kg(), (cin * 9, mid), jnp.float32)
    p["b"] = jnp.zeros((mid,), jnp.float32)
    return p


def init_basicvsr_pp(seed):
    kg = KeyGen(seed)
    P = {}
    spynet_cfg = [(8, 32), (32, 64), (64, 32), (32, 16), (16, 2)]
    P["spynet"] = [[conv_init(kg, ci, co, 7) for ci, co in spynet_cfg] for _ in range(6)]
    P["feat_extract"] = resblocks_init(kg, 3, MID, 5)
    P["deform_align"] = {}
    P["backbone"] = {}
    for i, m in enumerate(["backward_1", "forward_1", "backward_2", "forward_2"]):
        P["deform_align"][m] = deform_align_init(kg, MID, DG)
        P["backbone"][m] = resblocks_init(kg, (2 + i) * MID, MID, NUM_BLOCKS)
    P["reconstruction"] = resblocks_init(kg, 5 * MID, MID, 5)
    P["upsample1"] = conv_init(kg, MID, MID * 4, 3)
    P["upsample2"] = conv_init(kg, MID, 64 * 4, 3)
    P["conv_hr"] = conv_init(kg, 64, 64, 3)
    P["conv_last"] = conv_init(kg, 64, 3, 3)
    return P


# ==================================== main =====================================
if __name__ == "__main__":
    # self-check 1: 3x3 conv (exercises forced row banding + Cout padding)
    xt = jax.random.uniform(jax.random.PRNGKey(1), (1, 8, 32, 32), jnp.float32)
    wt = 0.2 * jax.random.normal(jax.random.PRNGKey(2), (3, 3, 8, 12), jnp.float32)
    bt = 0.1 * jax.random.normal(jax.random.PRNGKey(3), (12,), jnp.float32)
    ref = jax.lax.conv_general_dilated(
        xt, wt, (1, 1), "SAME",
        dimension_numbers=("NCHW", "HWIO", "NCHW")) + bt.reshape(1, -1, 1, 1)
    got = conv2d(xt, wt, bt, act="none")
    rel = float(jnp.max(jnp.abs(got - ref))) / max(1.0, float(jnp.max(jnp.abs(ref))))
    assert rel < 5e-2, f"3x3 conv self-check mismatch: rel={rel}"

    # self-check 2: 7x7 conv (exercises the big-tap fold used by SPyNet)
    xt7 = jax.random.uniform(jax.random.PRNGKey(4), (2, 8, 8, 8), jnp.float32)
    wt7 = 0.1 * jax.random.normal(jax.random.PRNGKey(5), (7, 7, 8, 16), jnp.float32)
    bt7 = 0.1 * jax.random.normal(jax.random.PRNGKey(6), (16,), jnp.float32)
    ref7 = jax.lax.conv_general_dilated(
        xt7, wt7, (1, 1), "SAME",
        dimension_numbers=("NCHW", "HWIO", "NCHW")) + bt7.reshape(1, -1, 1, 1)
    got7 = conv2d(xt7, wt7, bt7, act="none")
    rel7 = float(jnp.max(jnp.abs(got7 - ref7))) / max(1.0, float(jnp.max(jnp.abs(ref7))))
    assert rel7 < 5e-2, f"7x7 conv self-check mismatch: rel={rel7}"

    n, t, c, h, w = 1, 3, 3, 64, 64          # h, w >= 64 is required by the module's assert
    lqs = jax.random.uniform(jax.random.PRNGKey(0), (n, t, c, h, w), jnp.float32)

    params = init_basicvsr_pp(seed=0)
    out = basicvsr_pp_forward(params, lqs)
    out = jax.block_until_ready(out)

    assert out.shape == (n, t, 3, 4 * h, 4 * w), out.shape
    assert bool(jnp.all(jnp.isfinite(out)))
    print("KERNEL_OK")
</pallas_src>

<mosaic_0001>
module attributes {stable_mosaic.version = 11 : i64} {
  func.func @_conv_fold_kernel(%arg0: i32, %arg1: i32, %arg2: memref<1x8x614xbf16, #tpu.memory_space<vmem>>, %arg3: memref<16x72xbf16, #tpu.memory_space<vmem>>, %arg4: memref<16x1xf32, #tpu.memory_space<vmem>>, %arg5: memref<1x16x544xf32, #tpu.memory_space<vmem>>, %arg6: memref<72x544xbf16, #tpu.memory_space<vmem>>) attributes {dimension_semantics = [#tpu.dimension_semantics<parallel>, #tpu.dimension_semantics<parallel>], iteration_bounds = array<i64: 2, 1>, scalar_prefetch = 0 : i64, scratch_operands = 1 : i64, tpu.core_type = #tpu.core_type<tc>, window_params = [{transform_indices = @transform_0, window_bounds = array<i64: 1, 8, 614>}, {transform_indices = @transform_1, window_bounds = array<i64: 16, 72>}, {transform_indices = @transform_2, window_bounds = array<i64: 16, 1>}, {transform_indices = @transform_3, window_bounds = array<i64: 1, 16, 544>}]} {
    %c0 = arith.constant 0 : index
    %c0_0 = arith.constant 0 : index
    %c0_1 = arith.constant 0 : index
    %0 = vector.load %arg2[%c0, %c0_0, %c0_1] : memref<1x8x614xbf16, #tpu.memory_space<vmem>>, vector<1x8x544xbf16>
    %1 = vector.shape_cast %0 : vector<1x8x544xbf16> to vector<8x544xbf16>
    %c0_2 = arith.constant 0 : index
    %c0_3 = arith.constant 0 : index
    %2 = vector.load %arg6[%c0_2, %c0_3] : memref<72x544xbf16, #tpu.memory_space<vmem>>, vector<8x544xbf16>
    tpu.vector_store %arg6[%c0_2, %c0_3], %1 {strides = array<i32>} : memref<72x544xbf16, #tpu.memory_space<vmem>>, vector<8x544xbf16>,
    %c0_4 = arith.constant 0 : index
    %c0_5 = arith.constant 0 : index
    %c1 = arith.constant 1 : index
    %3 = vector.load %arg2[%c0_4, %c0_5, %c1] : memref<1x8x614xbf16, #tpu.memory_space<vmem>>, vector<1x8x544xbf16>
    %4 = vector.shape_cast %3 : vector<1x8x544xbf16> to vector<8x544xbf16>
    %c8 = arith.constant 8 : index
    %c0_6 = arith.constant 0 : index
    %5 = vector.load %arg6[%c8, %c0_6] : memref<72x544xbf16, #tpu.memory_space<vmem>>, vector<8x544xbf16>
    tpu.vector_store %arg6[%c8, %c0_6], %4 {strides = array<i32>} : memref<72x544xbf16, #tpu.memory_space<vmem>>, vector<8x544xbf16>,
    %c0_7 = arith.constant 0 : index
    %c0_8 = arith.constant 0 : index
    %c2 = arith.constant 2 : index
    %6 = vector.load %arg2[%c0_7, %c0_8, %c2] : memref<1x8x614xbf16, #tpu.memory_space<vmem>>, vector<1x8x544xbf16>
    %7 = vector.shape_cast %6 : vector<1x8x544xbf16> to vector<8x544xbf16>
    %c16 = arith.constant 16 : index
    %c0_9 = arith.constant 0 : index
    %8 = vector.load %arg6[%c16, %c0_9] : memref<72x544xbf16, #tpu.memory_space<vmem>>, vector<8x544xbf16>
    tpu.vector_store %arg6[%c16, %c0_9], %7 {strides = array<i32>} : memref<72x544xbf16, #tpu.memory_space<vmem>>, vector<8x544xbf16>,
    %c0_10 = arith.constant 0 : index
    %c0_11 = arith.constant 0 : index
    %c34 = arith.constant 34 : index
    %9 = vector.load %arg2[%c0_10, %c0_11, %c34] : memref<1x8x614xbf16, #tpu.memory_space<vmem>>, vector<1x8x544xbf16>
    %10 = vector.shape_cast %9 : vector<1x8x544xbf16> to vector<8x544xbf16>
    %c24 = arith.constant 24 : index
    %c0_12 = arith.constant 0 : index
    %11 = vector.load %arg6[%c24, %c0_12] : memref<72x544xbf16, #tpu.memory_space<vmem>>, vector<8x544xbf16>
    tpu.vector_store %arg6[%c24, %c0_12], %10 {strides = array<i32>} : memref<72x544xbf16, #tpu.memory_space<vmem>>, vector<8x544xbf16>,
    %c0_13 = arith.constant 0 : index
    %c0_14 = arith.constant 0 : index
    %c35 = arith.constant 35 : index
    %12 = vector.load %arg2[%c0_13, %c0_14, %c35] : memref<1x8x614xbf16, #tpu.memory_space<vmem>>, vector<1x8x544xbf16>
    %13 = vector.shape_cast %12 : vector<1x8x544xbf16> to vector<8x544xbf16>
    %c32 = arith.constant 32 : index
    %c0_15 = arith.constant 0 : index
    %14 = vector.load %arg6[%c32, %c0_15] : memref<72x544xbf16, #tpu.memory_space<vmem>>, vector<8x544xbf16>
    tpu.vector_store %arg6[%c32, %c0_15], %13 {strides = array<i32>} : memref<72x544xbf16, #tpu.memory_space<vmem>>, vector<8x544xbf16>,
    %c0_16 = arith.constant 0 : index
    %c0_17 = arith.constant 0 : index
    %c36 = arith.constant 36 : index
    %15 = vector.load %arg2[%c0_16, %c0_17, %c36] : memref<1x8x614xbf16, #tpu.memory_space<vmem>>, vector<1x8x544xbf16>
    %16 = vector.shape_cast %15 : vector<1x8x544xbf16> to vector<8x544xbf16>
    %c40 = arith.constant 40 : index
    %c0_18 = arith.constant 0 : index
    %17 = vector.load %arg6[%c40, %c0_18] : memref<72x544xbf16, #tpu.memory_space<vmem>>, vector<8x544xbf16>
    tpu.vector_store %arg6[%c40, %c0_18], %16 {strides = array<i32>} : memref<72x544xbf16, #tpu.memory_space<vmem>>, vector<8x544xbf16>,
    %c0_19 = arith.constant 0 : index
    %c0_20 = arith.constant 0 : index
    %c68 = arith.constant 68 : index
    %18 = vector.load %arg2[%c0_19, %c0_20, %c68] : memref<1x8x614xbf16, #tpu.memory_space<vmem>>, vector<1x8x544xbf16>
    %19 = vector.shape_cast %18 : vector<1x8x544xbf16> to vector<8x544xbf16>
    %c48 = arith.constant 48 : index
    %c0_21 = arith.constant 0 : index
    %20 = vector.load %arg6[%c48, %c0_21] : memref<72x544xbf16, #tpu.memory_space<vmem>>, vector<8x544xbf16>
    tpu.vector_store %arg6[%c48, %c0_21], %19 {strides = array<i32>} : memref<72x544xbf16, #tpu.memory_space<vmem>>, vector<8x544xbf16>,
    %c0_22 = arith.constant 0 : index
    %c0_23 = arith.constant 0 : index
    %c69 = arith.constant 69 : index
    %21 = vector.load %arg2[%c0_22, %c0_23, %c69] : memref<1x8x614xbf16, #tpu.memory_space<vmem>>, vector<1x8x544xbf16>
    %22 = vector.shape_cast %21 : vector<1x8x544xbf16> to vector<8x544xbf16>
    %c56 = arith.constant 56 : index
    %c0_24 = arith.constant 0 : index
    %23 = vector.load %arg6[%c56, %c0_24] : memref<72x544xbf16, #tpu.memory_space<vmem>>, vector<8x544xbf16>
    tpu.vector_store %arg6[%c56, %c0_24], %22 {strides = array<i32>} : memref<72x544xbf16, #tpu.memory_space<vmem>>, vector<8x544xbf16>,
    %c0_25 = arith.constant 0 : index
    %c0_26 = arith.constant 0 : index
    %c70 = arith.constant 70 : index
    %24 = vector.load %arg2[%c0_25, %c0_26, %c70] : memref<1x8x614xbf16, #tpu.memory_space<vmem>>, vector<1x8x544xbf16>
    %25 = vector.shape_cast %24 : vector<1x8x544xbf16> to vector<8x544xbf16>
    %c64 = arith.constant 64 : index
    %c0_27 = arith.constant 0 : index
    %26 = vector.load %arg6[%c64, %c0_27] : memref<72x544xbf16, #tpu.memory_space<vmem>>, vector<8x544xbf16>
    tpu.vector_store %arg6[%c64, %c0_27], %25 {strides = array<i32>} : memref<72x544xbf16, #tpu.memory_space<vmem>>, vector<8x544xbf16>,
    %c0_28 = arith.constant 0 : index
    %c0_29 = arith.constant 0 : index
    %27 = vector.load %arg3[%c0_28, %c0_29] : memref<16x72xbf16, #tpu.memory_space<vmem>>, vector<16x72xbf16>
    %c0_30 = arith.constant 0 : index
    %c0_31 = arith.constant 0 : index
    %28 = vector.load %arg6[%c0_30, %c0_31] : memref<72x544xbf16, #tpu.memory_space<vmem>>, vector<72x544xbf16>
    %cst = arith.constant dense<0.000000e+00> : vector<16x544xf32>
    %29 = tpu.matmul %27, %28, %cst {dimension_numbers = #tpu.dot_dimension_numbers<[1], [0], [0], [1], [0, 0, 1, 1], [], []>} : vector<16x72xbf16>, vector<72x544xbf16>, vector<16x544xf32> -> vector<16x544xf32>
    %c0_32 = arith.constant 0 : index
    %c0_33 = arith.constant 0 : index
    %30 = vector.load %arg4[%c0_32, %c0_33] : memref<16x1xf32, #tpu.memory_space<vmem>>, vector<16x1xf32>
    %31 = vector.broadcast %30 : vector<16x1xf32> to vector<16x544xf32>
    %32 = arith.addf %29, %31 : vector<16x544xf32>
    %c0_34 = arith.constant 0 : index
    %c0_35 = arith.constant 0 : index
    %c0_36 = arith.constant 0 : index
    %33 = vector.load %arg5[%c0_34, %c0_35, %c0_36] : memref<1x16x544xf32, #tpu.memory_space<vmem>>, vector<1x16x544xf32>
    %34 = vector.shape_cast %33 : vector<1x16x544xf32> to vector<16x544xf32>
    %35 = vector.shape_cast %32 : vector<16x544xf32> to vector<1x16x544xf32>
    tpu.vector_store %arg5[%c0_34, %c0_35, %c0_36], %35 {strides = array<i32>} : memref<1x16x544xf32, #tpu.memory_space<vmem>>, vector<1x16x544xf32>,
    return
  }
  func.func @transform_0(%arg0: i32, %arg1: i32) -> (i32, i32, i32) {
    %c0_i32 = arith.constant 0 : i32
    %c0_i32_0 = arith.constant 0 : i32
    %c0_i32_1 = arith.constant 0 : i32
    return %arg0, %c0_i32, %c0_i32_0 : i32, i32, i32
  }
  func.func @transform_1(%arg0: i32, %arg1: i32) -> (i32, i32) {
    %c0_i32 = arith.constant 0 : i32
    %c0_i32_0 = arith.constant 0 : i32
    return %arg1, %c0_i32 : i32, i32
  }
  func.func @transform_2(%arg0: i32, %arg1: i32) -> (i32, i32) {
    %c0_i32 = arith.constant 0 : i32
    %c0_i32_0 = arith.constant 0 : i32
    return %arg1, %c0_i32 : i32, i32
  }
  func.func @transform_3(%arg0: i32, %arg1: i32) -> (i32, i32, i32) {
    %c0_i32 = arith.constant 0 : i32
    %c0_i32_0 = arith.constant 0 : i32
    return %arg0, %arg1, %c0_i32 : i32, i32, i32
  }
}

</mosaic_0001>

<bundles_post_ra>
// kernel: tpu_custom_call.1
= control target key start
LH: loop header
LB: loop body
LE: loop exit
PB: predicated region body
PF: predicated region fallthrough
CT: control target
= control target key end

     0   :  { %8 = vsyncpa [#allocation4], 0  ;;  %s1461_s0 = inlined_call_operand.hbm [shape: bf16[2,8,614], index: 0, kind: input, shape index: {}]   ;;  %s1462_s1 = inlined_call_operand.vmem [shape: bf16[16,72], index: 1, kind: input, shape index: {}]   ;;  %s1463_s2 = inlined_call_operand.vmem [shape: f32[16,1], index: 2, kind: input, shape index: {}]   ;;  %s1464_s3 = inlined_call_operand.hbm [shape: f32[2,16,544], index: 3, kind: output, shape index: {}]  }
   0x1   :  { %10 = vsyncpa [#allocation4 + $0x1], 0 }
   0x2   :  { %11 = vsyncpa [#allocation5], 0 }
   0x3   :  { %13 = vsyncpa [#allocation5 + $0x1], 0  ;;  %s1208_s12 = smov 0   ;;  %s1210_s13 = smov 0  }
   0x4   :  { %s1212_s14 = smov 0   ;;  %s1214_s15 = smov 0  }
   0x5   :  { %s1216_s16 = smov 0   ;;  %s1218_s17 = smov 0  }
   0x6 LB: > { %s862_s18 = sadd.s32 4294967295, %s1175_s17   ;;  %s863_s19 = sadd.s32 4294967294, %s1175_s17   ;;  %s1175_s17 = sphi %s1218_s17, %s19_s17   ;;  %s1171_s16 = sphi %s1216_s16, %s1473_s16   ;;  %s1167_s15 = sphi %s1214_s15, %s1472_s15   ;;  %s1163_s14 = sphi %s1212_s14, %s1471_s14   ;;  %s1159_s13 = sphi %s1210_s13, %s1470_s13   ;;  %s1155_s12 = sphi %s1208_s12, %s1469_s12  }
   0x7   : > { %s31_s20 = sadd.s32 1, %s1171_s16  ;;  %s38_s21 = sadd.s32 1, %s1163_s14 }
   0x8   : > { %p33_p0 = scmp.ge.s32.totalorder %s31_s20, 2  ;;  %p45_p1 = scmp.ne.s32.totalorder %s1163_s14, %s1159_s13 }
   0x9   : > { %p46_p2 = scmp.eq.s32.totalorder %s1175_s17, 0  ;;  %p51_p3 = scmp.ne.s32.totalorder %s1159_s13, %s1155_s12 }
   0xa   : > { %s1475_s20 = smov (%p33_p0, %s31_s20), 0  ;;  %p52_p5 = scmp.eq.s32.totalorder %s862_s18, 0 }
   0xb   : > { %p1249_p4 = por %p46_p2, %p45_p1  ;;  %s35_s23 = ssub.s32 %s1171_s16, %s1475_s20 }
   0xc   : > { %p129_p6 = scmp.eq.s32.totalorder %s862_s18, 1  ;;  %p36_p7 = scmp.eq.s32.totalorder %s35_s23, 0 }
   0xd   : > { %p1255_p8 = por %p52_p5, %p51_p3  ;;  %p135_p10 = scmp.eq.s32.totalorder %s863_s19, 1 }
   0xe   : > { %p1259_p9 = por %p129_p6, %p45_p1  ;;  %p867_p12 = scmp.ge.s32.totalorder %s1175_s17, 2 }
   0xf   : > { %s1264_s26 = scalar_select %p36_p7, %s1163_s14, %s38_s21  }
  0x10   : > { %p1266_p11 = por %p135_p10, %p51_p3  ;;  %p1000_p13 = scmp.lt.s32.totalorder %s1175_s17, 2 }
  0x11   : > { %s173_s28 = sand.u32 1, %s1163_s14   ;;  %s984_s30 = smul.u32 20, %s1171_s16 }
  0x12   : > { %s983_s29 = smul.u32 20, %s173_s28  ;;  %p993_p0 = pnand %p1000_p13, %p1249_p4 }
  0x13   : > { %p869_p2 = scmp.ge.s32.totalorder %s1175_s17, 1  ;;  %s182_s6 = scalar_lea.hbm %s1461_s0, %s984_s30 }
  0x14   : > { %s177_s7 = scalar_lea.vmem [#allocation3], %s983_s29  ;;  %s184_s9 = sshll.u32 %s182_s6, 4  ;;  %s185_s9 = int_to_ptr.hbm [resolvable:$true] %s184_s9 }
  0x15   : > { %s186_s8 = sshll.u32 %s177_s7, 4  ;;  %s174_s10 = scalar_lea.sflag [#allocation4], %s173_s28  ;;  %s187_s8 = int_to_ptr.vmem [resolvable:$true] %s186_s8 }
  0x16   : > { %995 = dma.hbm_to_vmem [thread:$0]  (!%p993_p0), %s185_s9, 320, %s187_s8, %s174_s10  }
  0x17   : > { %p191_p1 = scmp.lt.s32.totalorder %s1175_s17, 3 }
  0x19   : > { %p192_p3 = pnand %p869_p2, %p191_p1 }
  0x1a   : > { %s1282_s11 = sand.u32 (!%p192_p3), 1, %s1159_s13  }
  0x1b   : > { %195 = sbr.rel (%p192_p3) target bundleno = 375 (0x177), region = 32  ;;  %s198_s19 = scalar_lea.sflag (!%p192_p3), [#allocation4], %s1282_s11 }
  0x1c   : > { %s985_s18 = smul.u32 (!%p192_p3), 20, %s1282_s11 }
  0x1e   : > { %s1286_s21 = scalar_lea.vmem (!%p192_p3), [#allocation3], %s985_s18 }
  0x20   : > { %1146 = dma.done.wait (%p1255_p8), %s198_s19, 320  }
  0x21   : > { %1148 = vsyncadd (%p1255_p8), %s198_s19, 4294966976  ;;  %v439_v0 = vld [vmem:[%s1286_s21] sm:$0xff]  ;;  %s1177_s22 = smov 58   ;;  %s1178_s23 = smov 59   ;;  %v440_v1 = vld [vmem:[%s1286_s21 + $0x8] sm:$0xff]  ;;  %vm271_vm0 = vcmask 1043456  }
  0x22   : > { %445 = vrot.lane.b32.xlu0 %v439_v0, %s1177_s22  ;;  %419 = vrot.lane.b32.xlu2 %v439_v0, %s1178_s23  ;;  %252 = vst [vmem:[#allocation2] sm:$0xff] %v439_v0  ;;  %s1179_s28 = smov 60   ;;  %v441_v2 = vld [vmem:[%s1286_s21 + $0x10] sm:$0xf]  ;;  %s1180_s24 = smov 93   ;;  %vm429_vm1 = vcmask 482304  }
  0x23   : > { %393 = vrot.lane.b32.xlu1 %v439_v0, %s1179_s28  ;;  %253 = vst [vmem:[#allocation2 + $0x8] sm:$0xff] %v440_v1  ;;  %s1181_s29 = smov 92   ;;  %s1182_s30 = smov 126   ;;  %v389_v3 = vld [vmem:[%s1286_s21 + $0x10] sm:$0xf]  ;;  %vm455_vm2 = vcmask 474112  }
  0x24   : > { %s1183_s4 = smov 94   ;;  %v415_v4 = vld [vmem:[%s1286_s21 + $0x10] sm:$0xf]  ;;  %s1184_s5 = smov 127   ;;  %vm403_vm3 = vcmask 490496   ;;  %vm254_vm4 = vcmask 257024  }
  0x25   : > { %v363_v5 = vld [vmem:[%s1286_s21 + $0x10] sm:$0xf]  ;;  %vm351_vm5 = vcmask 760832   ;;  %vm377_vm6 = vcmask 752640   ;;  %vm299_vm7 = vcmask 1031168   ;;  %vm325_vm8 = vcmask 769024  }
  0x26   : > { %v337_v6 = vld [vmem:[%s1286_s21 + $0x10] sm:$0xf]  ;;  %vm273_vm9 = vcmask 1039360   ;;  %vm628_vm10 = vcmask 588800   ;;  %s986_s19 = smul.u32 80, %s1282_s11  ;;  %vm722_vm11 = vcmask 261120  }
  0x27   : > { %v285_v7 = vld [vmem:[%s1286_s21 + $0x10] sm:$0xf]  ;;  %s1113_s8 = scalar_lea.hbm %s1464_s3, 160 }
  0x28   : > { %v258_v8 = vld [vmem:[%s1286_s21 + $0x10] sm:$0xf] }
  0x29   : > { %v311_v9 = vld [vmem:[%s1286_s21 + $0x10] sm:$0xf] }
  0x2a   : > { %447 = vrot.lane.b32.xlu0 %v440_v1, %s1177_s22  ;;  %421 = vrot.lane.b32.xlu2 %v440_v1, %s1178_s23 }
  0x2b   : > { %395 = vrot.lane.b32.xlu1 %v440_v1, %s1179_s28 }
  0x32   : > { %449 = vrot.lane.b32.xlu0 %v441_v2, %s1177_s22  ;;  %343 = vrot.lane.b32.xlu2 %v440_v1, %s1180_s24  ;;  %s987_s22 = smul.u32 80, %s1167_s15  ;;  %s730_s15 = scalar_lea.sflag [#allocation5], %s1282_s11 }
  0x33   : > { %341 = vrot.lane.b32.xlu1 %v439_v0, %s1180_s24 }
  0x3a   : > { %367 = vrot.lane.b32.xlu0 %v439_v0, %s1181_s29  ;;  %289 = vrot.lane.b32.xlu2 %v439_v0, %s1182_s30 }
  0x3b   : > { %369 = vrot.lane.b32.xlu1 %v440_v1, %s1181_s29 }
  0x42   : > { %291 = vrot.lane.b32.xlu0 %v440_v1, %s1182_s30  ;;  %317 = vrot.lane.b32.xlu2 %v440_v1, %s1183_s4 }
  0x43   : > { %315 = vrot.lane.b32.xlu1 %v439_v0, %s1183_s4 }
  0x4a   : > { %397 = vrot.lane.b32.xlu0 %v389_v3, %s1179_s28  ;;  %262 = vrot.lane.b32.xlu2 %v439_v0, %s1184_s5 }
  0x4b   : > { %423 = vrot.lane.b32.xlu1 %v415_v4, %s1178_s23 }
  0x52   : > { %264 = vrot.lane.b32.xlu0 %v440_v1, %s1184_s5  ;;  %371 = vrot.lane.b32.xlu2 %v363_v5, %s1181_s29 }
  0x53   : > { %345 = vrot.lane.b32.xlu1 %v337_v6, %s1180_s24  ;;  %s744_s24 = scalar_lea.hbm %s1464_s3, %s987_s22 }
  0x5a   : > { %293 = vrot.lane.b32.xlu0 %v285_v7, %s1182_s30  ;;  %266 = vrot.lane.b32.xlu2 %v258_v8, %s1184_s5  ;;  %v251_v8 = vld [vmem:[%s1286_s21 + $0x10] sm:$0xf]  ;;  %s1408_s21 = scalar_lea.vmem [#allocation6], %s986_s19  ;;  %s747_s30 = sshll.u32 %s744_s24, 4  ;;  %s748_s30 = int_to_ptr.hbm [resolvable:$true] %s747_s30 }
  0x5b   : > { %319 = vrot.lane.b32.xlu1 %v311_v9, %s1183_s4  ;;  %255 = vst.msk [vmem:[#allocation2 + $0x10] sm:$0xf] %vm254_vm4, %v251_v8  ;;  %s745_s29 = sshll.u32 %s1408_s21, 4  ;;  %s1107_s4 = sshra.s32 %s748_s30, 4  ;;  %s746_s29 = int_to_ptr.vmem [resolvable:$true] %s745_s29  ;;  %s1108_s4 = int_to_ptr.hbm [resolvable:$true] %s1107_s4 }
  0x5c   : > { %s1109_s5 = scalar_lea.hbm %s1108_s4, 80  ;;  %p1114_p7 = scmp.lt.s32.totalorder %s1108_s4, %s1464_s3 }
  0x5d   : > { %p1110_p4 = scmp.ne.s32.totalorder %s1108_s4, %s1109_s5  ;;  %p1115_p8 = scmp.lt.s32.totalorder %s1113_s8, %s1109_s5 }
  0x5f   : > { %p1111_p5 = pnand %p1110_p4, %p1259_p9  ;;  %p1116_p10 = por %p1115_p8, %p1114_p7 }
  0x61   : > { %p1112_p6 = pneg %p1111_p5 }
  0x63   : > { %p1117_p13 = pnand %p1116_p10, %p1112_p6 }
  0x7c   : > { %v420_v10 = vpop.permute.xlu2 %419 }
  0x7d   : > { %v425_v11 = vrot.slane %v420_v10, 4 }
  0x84   : > { %v1302_v12 = vpop.permute.xlu2 %421 }
  0x85   : > { %v426_v13 = vrot.slane %v1302_v12, 4 }
  0x87   : > { %v428_v14 = vsel %vm271_vm0, %v425_v11, %v426_v13 }
  0x88   : > { %v430_v15 = vsel %vm429_vm1, %v420_v10, %v428_v14 }
  0x89   : > { %436 = vst [vmem:[#allocation2 + $0x8c] sm:$0xff] %v430_v15 }
  0x8c   : > { %v1309_v16 = vpop.permute.xlu2 %343 }
  0x8d   : > { %v348_v35 = vrot.slane %v1309_v16, 4 }
  0x90   : > { %v980_v46 = vld [vmem:[#allocation2 + $0x88] sm:$0xf0]  ;;  %v938_v47 = vld [vmem:[#allocation2 + $0x8c] sm:$0xf0] }
  0x94   : > { %v446_v17 = vpop.permute.xlu0 %445  ;;  %v1311_v18 = vpop.permute.xlu2 %289 }
  0x95   : > { %v394_v19 = vpop.permute.xlu1 %393  ;;  %v451_v22 = vrot.slane %v446_v17, 4  ;;  %v295_v9 = vrot.slane %v1311_v18, 4 }
  0x96   : > { %v399_v25 = vrot.slane %v394_v19, 4 }
  0x9c   : > { %v448_v20 = vpop.permute.xlu0 %447  ;;  %v1313_v21 = vpop.permute.xlu2 %317 }
  0x9d   : > { %v452_v23 = vrot.slane %v448_v20, 4  ;;  %v1315_v24 = vpop.permute.xlu1 %395  ;;  %v322_v5 = vrot.slane %v1313_v21, 4 }
  0x9e   : > { %v400_v26 = vrot.slane %v1315_v24, 4 }
  0x9f   : > { %v454_v27 = vsel %vm271_vm0, %v451_v22, %v452_v23 }
  0xa0   : > { %v456_v28 = vsel %vm455_vm2, %v446_v17, %v454_v27  ;;  %v402_v29 = vsel %vm271_vm0, %v399_v25, %v400_v26 }
  0xa1   : > { %v404_v30 = vsel %vm403_vm3, %v394_v19, %v402_v29  ;;  %v578_v31 = vunpack.c.l.b16 %v456_v28  ;;  %v579_v32 = vunpack.c.h.b16 %v456_v28 }
  0xa2   : > { %410 = vst [vmem:[#allocation2 + $0x78] sm:$0xff] %v404_v30 }
  0xa3   : > { %v603_v33 = vpack.c.b16 %v578_v31, %v578_v31  ;;  %v604_v34 = vpack.c.b16 %v579_v32, %v579_v32 }
  0xa4   : > { %v450_v36 = vpop.permute.xlu0 %449  ;;  %v1325_v37 = vpop.permute.xlu2 %262 }
  0xa5   : > { %v453_v38 = vrot.slane %v450_v36, 4  ;;  %464 = vst.msk [vmem:[#allocation2 + $0xb0] sm:$0xf] %vm254_vm4, %v450_v36  ;;  %v342_v39 = vpop.permute.xlu1 %341  ;;  %v634_v40 = vsel %vm271_vm0, %v603_v33, 0  ;;  %v637_v41 = vsel %vm271_vm0, %v604_v34, 0 }
  0xa6   : > { %v347_v42 = vrot.slane %v342_v39, 4  ;;  %651 = vmatpush.bf16.msra.mxu0 %v634_v40  ;;  %665 = vmatpush.bf16.msra.mxu1 %v637_v41 }
  0xa7   : > { %v457_v43 = vsel %vm271_vm0, %v452_v23, %v453_v38 }
  0xa8   : > { %v458_v44 = vsel %vm455_vm2, %v448_v20, %v457_v43  ;;  %v350_v45 = vsel %vm271_vm0, %v347_v42, %v348_v35 }
  0xa9   : > { %v352_v48 = vsel %vm351_vm5, %v342_v39, %v350_v45  ;;  %v936_v49 = vld [vmem:[#allocation2 + $0x78] sm:$0xf]  ;;  %v978_v50 = vld [vmem:[#allocation2 + $0x7c] sm:$0xf]  ;;  %v580_v51 = vunpack.c.l.b16 %v458_v44  ;;  %v581_v52 = vunpack.c.h.b16 %v458_v44  ;;  %v1185_v45 = vmov 0  }
  0xaa   : > { %358 = vst [vmem:[#allocation2 + $0x50] sm:$0xff] %v352_v48  ;;  %v937_v53 = vor.u32 %v980_v46, %v936_v49  ;;  %v941_v54 = vor.u32 %v978_v50, %v938_v47  ;;  %1061 = vset.pattern.permute.xlu0 %v1185_v45  ;;  %1062 = vset.pattern.permute.xlu1 %v1185_v45  ;;  %v268_v46 = vrot.slane %v1325_v37, 4 }
  0xab   : > { %v605_v55 = vpack.c.b16 %v580_v51, %v580_v51  ;;  %v606_v56 = vpack.c.b16 %v581_v52, %v581_v52 }
  0xac   : > { %v368_v57 = vpop.permute.xlu0 %367  ;;  %v372_v58 = vpop.permute.xlu2 %371  ;;  %652 = vmatpush.bf16.msra.mxu0 %v937_v53  ;;  %666 = vmatpush.bf16.msra.mxu1 %v941_v54  ;;  %v493_v51 = vld [vmem:[#allocation2 + $0xb0] sm:$0xf] }
  0xad   : > { %v373_v59 = vrot.slane %v368_v57, 4  ;;  %v370_v60 = vpop.permute.xlu1 %369  ;;  %v375_v61 = vrot.slane %v372_v58, 4  ;;  %386 = vst.msk [vmem:[#allocation2 + $0x74] sm:$0xf] %vm254_vm4, %v372_v58  ;;  %v640_v62 = vsel %vm271_vm0, %v605_v55, 0  ;;  %v643_v63 = vsel %vm271_vm0, %v606_v56, 0 }
  0xae   : > { %v374_v0 = vrot.slane %v370_v60, 4  ;;  %679 = vmatpush.bf16.msra.mxu2 %v640_v62  ;;  %693 = vmatpush.bf16.msra.mxu3 %v643_v63 }
  0xb0   : > { %v376_v1 = vsel %vm271_vm0, %v373_v59, %v374_v0  ;;  %v379_v2 = vsel %vm271_vm0, %v374_v0, %v375_v61 }
  0xb1   : > { %v378_v3 = vsel %vm377_vm6, %v368_v57, %v376_v1  ;;  %v380_v4 = vsel %vm377_vm6, %v370_v60, %v379_v2  ;;  %v916_v20 = vld [vmem:[#allocation2 + $0x50] sm:$0xf]  ;;  %v973_v22 = vld [vmem:[#allocation2 + $0x54] sm:$0xf]  ;;  %v495_v57 = vld [vmem:[%s1463_s2 + $0x8] sm:$0xff] }
  0xb2   : > { %384 = vst [vmem:[#allocation2 + $0x64] sm:$0xff] %v378_v3  ;;  %503 = vperm.xlu1 %1062, %v495_v57   ;;  %v876_v1 = vld [vmem:[#allocation2] sm:$0xf] }
  0xb3   : > { %385 = vst [vmem:[#allocation2 + $0x6c] sm:$0xff] %v380_v4 }
  0xb4   : > { %v1342_v6 = vpop.permute.xlu0 %291  ;;  %v267_v7 = vpop.permute.xlu2 %266 }
  0xb5   : > { %v316_v10 = vpop.permute.xlu1 %315  ;;  %v296_v11 = vrot.slane %v1342_v6, 4  ;;  %282 = vst.msk [vmem:[#allocation2 + $0x24] sm:$0xf] %vm254_vm4, %v267_v7 }
  0xb6   : > { %v321_v14 = vrot.slane %v316_v10, 4 }
  0xb7   : > { %v298_v15 = vsel %vm271_vm0, %v295_v9, %v296_v11 }
  0xb8   : > { %v324_v17 = vsel %vm271_vm0, %v321_v14, %v322_v5  ;;  %v300_v19 = vsel %vm299_vm7, %v1311_v18, %v298_v15 }
  0xb9   : > { %v326_v23 = vsel %vm325_vm8, %v316_v10, %v324_v17  ;;  %306 = vst [vmem:[#allocation2 + $0x28] sm:$0xff] %v300_v19  ;;  %v975_v25 = vld [vmem:[#allocation2 + $0x60] sm:$0xf0]  ;;  %v918_v27 = vld [vmem:[#allocation2 + $0x64] sm:$0xf0] }
  0xba   : > { %332 = vst [vmem:[#allocation2 + $0x3c] sm:$0xff] %v326_v23  ;;  %v917_v28 = vor.u32 %v975_v25, %v916_v20  ;;  %v921_v29 = vor.u32 %v973_v22, %v918_v27  ;;  %v976_v4 = vld [vmem:[#allocation2 + $0x68] sm:$0xf0]  ;;  %v926_v14 = vld [vmem:[#allocation2 + $0x6c] sm:$0xf0] }
  0xbc   : > { %653 = vmatpush.bf16.msra.mxu0 %v917_v28  ;;  %667 = vmatpush.bf16.msra.mxu1 %v921_v29  ;;  %v398_v30 = vpop.permute.xlu0 %397  ;;  %v977_v29 = vld [vmem:[#allocation2 + $0x70] sm:$0xf0] }
  0xbd   : > { %v424_v31 = vpop.permute.xlu1 %423  ;;  %v401_v32 = vrot.slane %v398_v30, 4  ;;  %412 = vst.msk [vmem:[#allocation2 + $0x88] sm:$0xf] %vm254_vm4, %v398_v30 }
  0xbe   : > { %v427_v33 = vrot.slane %v424_v31, 4  ;;  %438 = vst.msk [vmem:[#allocation2 + $0x9c] sm:$0xf] %vm254_vm4, %v424_v31 }
  0xbf   : > { %v405_v18 = vsel %vm271_vm0, %v400_v26, %v401_v32  ;;  %v270_v26 = vrot.slane %v267_v7, 4 }
  0xc0   : > { %v431_v34 = vsel %vm271_vm0, %v426_v13, %v427_v33  ;;  %v406_v36 = vsel %vm403_vm3, %v1315_v24, %v405_v18  ;;  %v896_v38 = vld [vmem:[#allocation2 + $0x28] sm:$0xf]  ;;  %v968_v39 = vld [vmem:[#allocation2 + $0x2c] sm:$0xf]  ;;  %v494_v13 = vld [vmem:[%s1463_s2] sm:$0xff] }
  0xc1   : > { %v432_v40 = vsel %vm429_vm1, %v1302_v12, %v431_v34  ;;  %411 = vst [vmem:[#allocation2 + $0x80] sm:$0xff] %v406_v36  ;;  %v970_v41 = vld [vmem:[#allocation2 + $0x38] sm:$0xf0]  ;;  %v898_v42 = vld [vmem:[#allocation2 + $0x3c] sm:$0xf0]  ;;  %498 = vperm.xlu0 %1061, %v494_v13  }
  0xc2   : > { %437 = vst [vmem:[#allocation2 + $0x94] sm:$0xff] %v432_v40  ;;  %v897_v43 = vor.u32 %v970_v41, %v896_v38  ;;  %v901_v44 = vor.u32 %v968_v39, %v898_v42  ;;  %v884_v38 = vld [vmem:[#allocation2 + $0x8] sm:$0xf]  ;;  %v964_v41 = vld [vmem:[#allocation2 + $0xc] sm:$0xf] }
  0xc4   : > { %654 = vmatpush.bf16.msra.mxu0 %v897_v43  ;;  %668 = vmatpush.bf16.msra.mxu1 %v901_v44  ;;  %v265_v24 = vpop.permute.xlu0 %264 }
  0xc5   : > { %v346_v12 = vpop.permute.xlu1 %345  ;;  %v269_v47 = vrot.slane %v265_v24, 4  ;;  %v982_v27 = vld [vmem:[#allocation2 + $0x98] sm:$0xf0] }
  0xc6   : > { %v349_v48 = vrot.slane %v346_v12, 4  ;;  %360 = vst.msk [vmem:[#allocation2 + $0x60] sm:$0xf] %vm254_vm4, %v346_v12 }
  0xc7   : > { %v272_v49 = vsel %vm271_vm0, %v268_v46, %v269_v47  ;;  %v275_v50 = vsel %vm271_vm0, %v269_v47, %v270_v26  ;;  %v967_v46 = vld [vmem:[#allocation2 + $0x20] sm:$0xf0] }
  0xc8   : > { %v353_v52 = vsel %vm271_vm0, %v348_v35, %v349_v48  ;;  %v274_v53 = vsel %vm273_vm9, %v1325_v37, %v272_v49  ;;  %v276_v54 = vsel %vm273_vm9, %v265_v24, %v275_v50  ;;  %v944_v55 = vld [vmem:[#allocation2 + $0x80] sm:$0xf]  ;;  %v979_v56 = vld [vmem:[#allocation2 + $0x84] sm:$0xf]  ;;  %v582_v37 = vunpack.c.l.b16 %v493_v51  ;;  %v892_v24 = vld [vmem:[#allocation2 + $0x10] sm:$0xf] }
  0xc9   : > { %v354_v58 = vsel %vm351_vm5, %v1309_v16, %v353_v52  ;;  %280 = vst [vmem:[#allocation2 + $0x14] sm:$0xff] %v274_v53  ;;  %v981_v59 = vld [vmem:[#allocation2 + $0x90] sm:$0xf0]  ;;  %v946_v60 = vld [vmem:[#allocation2 + $0x94] sm:$0xf0]  ;;  %v893_v12 = vor.u32 %v967_v46, %v892_v24 }
  0xca   : > { %359 = vst [vmem:[#allocation2 + $0x58] sm:$0xff] %v354_v58  ;;  %v945_v61 = vor.u32 %v981_v59, %v944_v55  ;;  %v949_v62 = vor.u32 %v979_v56, %v946_v60  ;;  %v963_v16 = vld [vmem:[#allocation2 + $0x4] sm:$0xf]  ;;  %v607_v15 = vpack.c.b16 %v582_v37, %v582_v37 }
  0xcb   : > { %281 = vst [vmem:[#allocation2 + $0x1c] sm:$0xff] %v276_v54 }
  0xcc   : > { %680 = vmatpush.bf16.msra.mxu2 %v945_v61  ;;  %694 = vmatpush.bf16.msra.mxu3 %v949_v62  ;;  %v294_v35 = vpop.permute.xlu0 %293 }
  0xcd   : > { %v320_v63 = vpop.permute.xlu1 %319  ;;  %v297_v0 = vrot.slane %v294_v35, 4  ;;  %308 = vst.msk [vmem:[#allocation2 + $0x38] sm:$0xf] %vm254_vm4, %v294_v35  ;;  %v932_v32 = vld [vmem:[#allocation2 + $0x60] sm:$0xf] }
  0xce   : > { %v323_v2 = vrot.slane %v320_v63, 4  ;;  %334 = vst.msk [vmem:[#allocation2 + $0x4c] sm:$0xf] %vm254_vm4, %v320_v63  ;;  %v933_v39 = vor.u32 %v977_v29, %v932_v32 }
  0xcf   : > { %v301_v3 = vsel %vm271_vm0, %v296_v11, %v297_v0 }
  0xd0   : > { %v327_v7 = vsel %vm271_vm0, %v322_v5, %v323_v2  ;;  %v302_v8 = vsel %vm299_vm7, %v1342_v6, %v301_v3  ;;  %v965_v9 = vld [vmem:[#allocation2 + $0x10] sm:$0xf0]  ;;  %v878_v10 = vld [vmem:[#allocation2 + $0x14] sm:$0xf0]  ;;  %v962_v5 = vld [vmem:[%s1462_s1] sm:$0xff]  ;;  %v646_v6 = vsel %vm271_vm0, %v607_v15, 0 }
  0xd1   : > { %v328_v17 = vsel %vm325_vm8, %v1313_v21, %v327_v7  ;;  %307 = vst [vmem:[#allocation2 + $0x30] sm:$0xff] %v302_v8  ;;  %v877_v19 = vor.u32 %v965_v9, %v876_v1  ;;  %v881_v20 = vor.u32 %v963_v16, %v878_v10  ;;  %v924_v22 = vld [vmem:[#allocation2 + $0x58] sm:$0xf]  ;;  %v974_v11 = vld [vmem:[#allocation2 + $0x5c] sm:$0xf] }
  0xd2   : > { %333 = vst [vmem:[#allocation2 + $0x44] sm:$0xff] %v328_v17  ;;  %v925_v23 = vor.u32 %v976_v4, %v924_v22  ;;  %v929_v25 = vor.u32 %v974_v11, %v926_v14  ;;  %v952_v21 = vld [vmem:[#allocation2 + $0x88] sm:$0xf]  ;;  %v966_v40 = vld [vmem:[#allocation2 + $0x18] sm:$0xf0] }
  0xd3   : > { %655 = vmatpush.bf16.msra.mxu0 %v877_v19  ;;  %669 = vmatpush.bf16.msra.mxu1 %v881_v20  ;;  %v953_v28 = vor.u32 %v982_v27, %v952_v21  ;;  %v886_v42 = vld [vmem:[#allocation2 + $0x1c] sm:$0xf0]  ;;  %v885_v45 = vor.u32 %v966_v40, %v884_v38 }
  0xd4   : > { %681 = vmatpush.bf16.msra.mxu2 %v925_v23  ;;  %695 = vmatpush.bf16.msra.mxu3 %v929_v25  ;;  %v912_v43 = vld [vmem:[#allocation2 + $0x38] sm:$0xf]  ;;  %v889_v26 = vor.u32 %v964_v41, %v886_v42 }
  0xd5   : > { %v972_v44 = vld [vmem:[#allocation2 + $0x48] sm:$0xf0] }
  0xd6   : > { %954 = vmatmul.msk.bf16.vlgmr.msra.gmra.mxu0 %vm628_vm10, %v962_v5  ;;  %955 = vmatmul.msk.bf16.vlgmr.msra.gmra.mxu1 %vm628_vm10, %v962_v5  ;;  %v913_v13 = vor.u32 %v972_v44, %v912_v43 }
  0xd7   : > { %707 = vmatpush.bf16.msrb.mxu0 %v646_v6 }
  0xd8   : > { %v904_v30 = vld [vmem:[#allocation2 + $0x30] sm:$0xf]  ;;  %v969_v31 = vld [vmem:[#allocation2 + $0x34] sm:$0xf] }
  0xd9   : > { %v971_v33 = vld [vmem:[#allocation2 + $0x40] sm:$0xf0]  ;;  %v906_v18 = vld [vmem:[#allocation2 + $0x44] sm:$0xf0] }
  0xda   : > { %v905_v34 = vor.u32 %v971_v33, %v904_v30  ;;  %v909_v36 = vor.u32 %v969_v31, %v906_v18 }
  0xdb   : > { %708 = vmatpush.bf16.msrb.mxu0 %v953_v28 }
  0xdc   : > { %682 = vmatpush.bf16.msra.mxu2 %v905_v34  ;;  %696 = vmatpush.bf16.msra.mxu3 %v909_v36 }
  0xdf   : > { %709 = vmatpush.bf16.msrb.mxu0 %v933_v39 }
  0xe0   : > { %683 = vmatpush.bf16.msra.mxu2 %v885_v45  ;;  %697 = vmatpush.bf16.msra.mxu3 %v889_v26 }
  0xe3   : > { %710 = vmatpush.bf16.msrb.mxu0 %v913_v13  ;;  %956 = vmatmul.msk.bf16.vlgmr.msra.gmra.mxu2 %vm628_vm10, %v962_v5 }
  0xe4   : > { %957 = vmatmul.msk.bf16.vlgmr.msra.gmra.mxu3 %vm628_vm10, %v962_v5 }
  0xe7   : > { %711 = vmatpush.bf16.msrb.mxu0 %v893_v12 }
  0xea   : > { %958 = vmatmul.msk.bf16.vlgmr.msrb.gmra.mxu0 %vm628_vm10, %v962_v5 }
 0x124   : > { %v504_v52 = vpop.permute.xlu1 %503 }
 0x133   : > { %v499_v47 = vpop.permute.xlu0 %498 }
 0x153   : > { %v657_v48 = vpop.f32.mrf.mxu0  ;;  %v671_v49 = vpop.f32.mrf.mxu1 }
 0x154   : > { %v658_v50 = vadd.f32 %v657_v48, %v499_v47  ;;  %v672_v51 = vadd.f32 %v671_v49, %v499_v47 }
 0x156   : > { %718 = vst [vmem:[%s1408_s21] sm:$0xff] %v658_v50 }
 0x157   : > { %719 = vst [vmem:[%s1408_s21 + $0x8] sm:$0xff] %v672_v51 }
 0x15b   : > { %v659_v53 = vpop.f32.mrf.mxu0  ;;  %v673_v54 = vpop.f32.mrf.mxu1 }
 0x15c   : > { %v660_v55 = vadd.f32 %v659_v53, %v504_v52  ;;  %v674_v56 = vadd.f32 %v673_v54, %v504_v52 }
 0x15e   : > { %724 = vst [vmem:[%s1408_s21 + $0x28] sm:$0xff] %v660_v55 }
 0x15f   : > { %725 = vst [vmem:[%s1408_s21 + $0x30] sm:$0xff] %v674_v56 }
 0x166   : > { %v685_v59 = vpop.f32.mrf.mxu2 }
 0x167   : > { %v713_v57 = vpop.f32.mrf.mxu0  ;;  %v699_v60 = vpop.f32.mrf.mxu3  ;;  %v686_v61 = vadd.f32 %v685_v59, %v499_v47 }
 0x168   : > { %v714_v58 = vadd.f32 %v713_v57, %v499_v47  ;;  %v700_v62 = vadd.f32 %v699_v60, %v499_v47 }
 0x169   : > { %720 = vst [vmem:[%s1408_s21 + $0x10] sm:$0xff] %v686_v61 }
 0x16a   : > { %723 = vst.msk [vmem:[%s1408_s21 + $0x20] sm:$0xff] %vm722_vm11, %v714_v58 }
 0x16b   : > { %721 = vst [vmem:[%s1408_s21 + $0x18] sm:$0xff] %v700_v62 }
 0x16e   : > { %v687_v63 = vpop.f32.mrf.mxu2 }
 0x16f   : > { %v715_v35 = vpop.f32.mrf.mxu0  ;;  %v701_v0 = vpop.f32.mrf.mxu3  ;;  %v688_v1 = vadd.f32 %v687_v63, %v504_v52 }
 0x170   : > { %v716_v37 = vadd.f32 %v715_v35, %v504_v52  ;;  %v702_v2 = vadd.f32 %v701_v0, %v504_v52 }
 0x171   : > { %726 = vst [vmem:[%s1408_s21 + $0x38] sm:$0xff] %v688_v1 }
 0x172   : > { %728 = vst.msk [vmem:[%s1408_s21 + $0x48] sm:$0xff] %vm722_vm11, %v716_v37 }
 0x173   : > { %727 = vst [vmem:[%s1408_s21 + $0x40] sm:$0xff] %v702_v2 }
 0x174   : > { %1120 = shalt.err (!%p1117_p13)
}
 0x175   : > { %s1186_s11 = smov 640   ;;  %s1187_s18 = smov 40  }
 0x176   : > { %990 = dma.vmem_to_hbm [thread:$0]  (%p1259_p9), %s746_s29, 1280, %s748_s30, %s730_s15, %s1186_s11, %s1186_s11, %s1187_s18  }
 0x177 PF: > { %s762_s19 = sand.u32 1, %s1155_s12   ;;  %p997_p0 = pnand %p867_p12, %p1266_p11 }
 0x178   : > { %s763_s21 = scalar_lea.sflag [#allocation5], %s762_s19 }
 0x179   : > { %p998_p2 = pneg %p997_p0 }
 0x17b   : > { %1150 = dma.done.wait (%p998_p2), %s763_s21, 1280  }
 0x17c   : > { %1152 = vsyncadd (%p998_p2), %s763_s21, 4294966016  ;;  %s19_s17 = sadd.s32 1, %s1175_s17   ;;  %s1469_s12 = smov %s1159_s13 }
 0x17d   : > { %p16_p1 = scmp.ge.s32.totalorder %s19_s17, 4   ;;  %s1470_s13 = smov %s1163_s14 }
 0x17e   : > { %s1471_s14 = smov %s1264_s26  ;;  %s1472_s15 = smov %s1171_s16 }
 0x17f   : > { %s1473_s16 = smov %s1475_s20  ;;  %18 = sbr.rel (!%p16_p1) target bundleno = 6 (0x6), region = 83 }
 0x184   :  { %769 = vsyncpa [#allocation4], 1 }
 0x185   :  { %771 = vsyncpa [#allocation4 + $0x1], 1 }
 0x186   :  { %772 = vsyncpa [#allocation5], 1 }
 0x187   :  { %774 = vsyncpa [#allocation5 + $0x1], 1 }

</bundles_post_ra>
